<compile_context>
chip_gen: v7x
topology: tpu7x:2x2x1
jax: 0.10.0
libtpu: 0.0.40
codegen_flags: <defaults>
</compile_context>

<pallas_src>
import jax
import jax.numpy as jnp
from jax import lax
from jax.experimental import pallas as pl
from jax.experimental.pallas import tpu as pltpu

LANE = 128


def _round_up(x, m):
    return ((x + m - 1) // m) * m


def _pad2(a, rows, cols):
    return jnp.pad(a, ((0, rows - a.shape[0]), (0, cols - a.shape[1])))


def _vmem_capacity_bytes():
    try:
        return int(pltpu.get_tpu_info().vmem_capacity_bytes)
    except Exception:
        return 64 << 20  # conservative fallback (v7x per-core VMEM)


def _make_kernel(*, TR, TR_out, Hp, Lp, L, expand, stride, use_res):
    """Kernel over one row-block containing TB whole (padded) samples."""

    def kernel(*refs):
        if expand:
            x_ref, w1_ref, vec_ref, w3_ref, b3_ref, o_ref, h_sc = refs
        else:
            x_ref, vec_ref, w3_ref, b3_ref, o_ref, h_sc = refs

        x = x_ref[...]                                   # (TR, Cp_in) f32

        # Zero only the scratch halo rows (cheap, 16 rows) so taps can never
        # read stale VMEM; the boundary masks below additionally guarantee
        # halo/boundary taps never reach valid outputs.
        zeros8 = jnp.zeros((8, Hp), jnp.float32)
        h_sc[pl.ds(0, 8), :] = zeros8
        h_sc[pl.ds(TR + 8, 8), :] = zeros8

        # ---- 1x1 expansion conv (BN scale folded into w1) + bias + ReLU6 ----
        if expand:
            h = jnp.dot(x.astype(w1_ref.dtype), w1_ref[...],
                        preferred_element_type=jnp.float32)
            h = jnp.clip(h + vec_ref[4:5, :], 0.0, 6.0)  # (TR, Hp) f32
        else:
            h = x                                        # hidden == C_in (f32)

        # ---- depthwise k=3, pad=1 conv along rows ----
        # Stage h ONCE at a sublane-aligned offset (row 8): the store hits the
        # scarce vst slot aligned/unmasked.  The +-1 shifted taps and the
        # centre tap are read back from the single VMEM copy (low vreg
        # pressure around the two matmuls).
        h_sc[pl.ds(8, TR), :] = h

        t_m = h_sc[pl.ds(7, TR), :]                      # h[r-1]
        t_c = h_sc[pl.ds(8, TR), :]                      # h[r]
        t_p = h_sc[pl.ds(9, TR), :]                      # h[r+1]

        # Boundary masks built in-kernel (no lane-width-1 input streams/DMAs).
        j = lax.broadcasted_iota(jnp.int32, (TR, 1), 0)
        r = j % Lp                                       # row index in sample
        ml = r > 0                                       # left pad / sample start
        mr = r < (L - 1)                                 # right pad / Lp padding

        k0 = vec_ref[0:1, :]
        k1 = vec_ref[1:2, :]
        k2 = vec_ref[2:3, :]
        b2 = vec_ref[3:4, :]
        d = (jnp.where(ml, t_m, 0.0) * k0 + t_c * k1
             + jnp.where(mr, t_p, 0.0) * k2)
        d = jnp.clip(d + b2, 0.0, 6.0)                   # (TR, Hp) f32

        # ---- stride-2: decimate rows via a disjoint, aligned scratch region ----
        if stride == 2:
            # TODO(synk): compute the depthwise only at output rows via
            # odd-start strided tap reads to halve this stage; kept full-rate
            # with an aligned, non-overlapping (no WAR hazard) decimation.
            h_sc[pl.ds(TR + 16, TR), :] = d
            d = h_sc[pl.ds(TR + 16, TR_out, stride=2), :]

        # ---- 1x1 projection conv (BN scale folded) + bias, linear bottleneck ----
        y = jnp.dot(d.astype(w3_ref.dtype), w3_ref[...],
                    preferred_element_type=jnp.float32)
        y = y + b3_ref[...]

        if use_res:
            y = y + x                                    # residual in full f32

        o_ref[...] = y.astype(o_ref.dtype)

    return kernel


def inverted_residual(x, params, *, stride, expansion_factor, batch_tile=None,
                      matmul_dtype=jnp.bfloat16, out_dtype=None,
                      channels_last=False):
    """x: (N, C_in, L) (PyTorch NCL) or (N, L, C_in) if channels_last.

    Returns (N, C_out, L_out) (or (N, L_out, C_out) if channels_last).
    matmul_dtype controls the MXU operand dtype (bf16 default, f32 accumulate).
    """
    assert stride in (1, 2)
    w1, s1, b1, dwk, s2, b2, w3, s3, b3 = params
    if channels_last:
        N, L, C_in = x.shape
    else:
        N, C_in, L = x.shape
    hidden, C_out = w3.shape
    expand = expansion_factor != 1
    use_res = (stride == 1) and (C_in == C_out)
    L_out = (L - 1) // stride + 1                        # kernel=3, pad=1
    if out_dtype is None:
        out_dtype = x.dtype

    # Padded geometry: channels -> lane-dense x128, rows -> x16.
    Lp = _round_up(L, 16)
    Cp_in = _round_up(C_in, LANE)
    Hp = _round_up(hidden, LANE)
    Cp_out = _round_up(C_out, LANE)
    Lp_out = Lp // stride

    phys_vmem = _vmem_capacity_bytes()

    # Batch tile: pack whole samples per block so the matmul M dim is a few
    # hundred/thousand rows, never splitting a sample.  Keep >= 2 grid steps
    # whenever N >= 2 so the "parallel" axis can shard across v7x's two TCs.
    if batch_tile is None:
        target_rows = 1024 if phys_vmem >= (96 << 20) else 512
        max_tb = N if N < 2 else max(1, N // 2)
        batch_tile = 1
        for d in range(1, N + 1):
            if N % d == 0 and d <= max_tb and d * Lp <= max(target_rows, Lp):
                batch_tile = d
    TB = batch_tile
    assert N % TB == 0, "batch_tile must divide N"
    TR, TR_out = TB * Lp, TB * Lp_out
    grid = (N // TB,)

    f32 = jnp.float32

    # ---- host-side prep: lane-dense (N*Lp, Cp_in) slab; x stays f32 so the
    # residual / expand==1 depthwise keep full precision (only the MXU
    # operands are cast to matmul_dtype inside the kernel). ----
    x_nlc = x if channels_last else jnp.transpose(x, (0, 2, 1))
    x_nlc = jnp.pad(x_nlc.astype(f32), ((0, 0), (0, Lp - L), (0, Cp_in - C_in)))
    x2d = x_nlc.reshape(N * Lp, Cp_in)

    # ---- fold BN scales into conv weights; pack per-hidden-channel vectors ----
    vecH = jnp.zeros((8, Hp), f32)
    vecH = vecH.at[0:3, :].set(_pad2((dwk * s2).astype(f32), 3, Hp))   # dw taps * s2
    vecH = vecH.at[3:4, :].set(_pad2(b2.astype(f32), 1, Hp))           # dw bias
    if expand:
        vecH = vecH.at[4:5, :].set(_pad2(b1.astype(f32), 1, Hp))       # expand bias
        w1f = _pad2((w1 * s1).astype(matmul_dtype), Cp_in, Hp)
    w3f = _pad2((w3 * s3).astype(matmul_dtype), Hp, Cp_out)
    b3p = _pad2(b3.astype(f32), 1, Cp_out)

    def _full(a):
        return pl.BlockSpec(a.shape, lambda i, _nd=a.ndim: (0,) * _nd)

    args = [x2d]
    specs = [pl.BlockSpec((TR, Cp_in), lambda i: (i, 0))]
    if expand:
        args.append(w1f)
        specs.append(_full(w1f))
    args += [vecH, w3f, b3p]
    specs += [_full(vecH), _full(w3f), _full(b3p)]

    sc_rows = TR + 16 + (TR if stride == 2 else 0)
    scratch_shapes = [pltpu.VMEM((sc_rows, Hp), f32)]

    # Generation-aware VMEM budget: ~60% of physical capacity (<= 96 MiB),
    # i.e. ~38 MiB on v7x (64 MiB VMEM), ~77 MiB on v5e/v6e (128 MiB).
    w_isize = jnp.dtype(matmul_dtype).itemsize
    o_isize = jnp.dtype(out_dtype).itemsize
    est = (2 * TR * Cp_in * 4                            # x blocks (f32, 2-buf)
           + 2 * TR_out * Cp_out * o_isize               # out blocks (2-buf)
           + 2 * (Cp_in * Hp + Hp * Cp_out) * w_isize    # 1x1 weights
           + 2 * (8 * Hp + Cp_out) * 4                   # packed vectors + b3
           + sc_rows * Hp * 4)                           # depthwise scratch
    cap = min(int(phys_vmem * 0.6), 96 << 20)
    vmem_limit = int(min(max(2 * est, 16 << 20), cap))

    kernel = _make_kernel(TR=TR, TR_out=TR_out, Hp=Hp, Lp=Lp, L=L,
                          expand=expand, stride=stride, use_res=use_res)

    out2d = pl.pallas_call(
        kernel,
        out_shape=jax.ShapeDtypeStruct((N * Lp_out, Cp_out), out_dtype),
        grid=grid,
        in_specs=specs,
        out_specs=pl.BlockSpec((TR_out, Cp_out), lambda i: (i, 0)),
        scratch_shapes=scratch_shapes,
        compiler_params=pltpu.CompilerParams(
            dimension_semantics=("parallel",),
            vmem_limit_bytes=vmem_limit),
    )(*args)

    out = out2d.reshape(N, Lp_out, Cp_out)[:, :L_out, :C_out]
    if channels_last:
        return out
    return jnp.transpose(out, (0, 2, 1))                 # back to NCL


def make_params(key, C_in, C_out, expansion_factor, dtype=jnp.float32):
    """Deterministic synthetic parameters; BN folded into (scale, bias)."""
    hidden = int(C_in * expansion_factor)
    ks = jax.random.split(key, 15)

    def bn(kg, kb, km, kv, c):
        gamma = 1.0 + 0.1 * jax.random.normal(kg, (c,), dtype)
        beta = 0.1 * jax.random.normal(kb, (c,), dtype)
        mean = 0.1 * jax.random.normal(km, (c,), dtype)
        var = jax.random.uniform(kv, (c,), dtype, minval=0.5, maxval=1.5)
        scale = gamma / jnp.sqrt(var + 1e-5)
        bias = beta - mean * scale
        return scale[None, :], bias[None, :]

    w1 = 0.2 * jax.random.normal(ks[0], (C_in, hidden), dtype)     # 1x1 expand
    s1, b1 = bn(ks[1], ks[2], ks[3], ks[4], hidden)
    dwk = 0.3 * jax.random.normal(ks[5], (3, hidden), dtype)       # depthwise taps
    s2, b2 = bn(ks[6], ks[7], ks[8], ks[9], hidden)
    w3 = 0.2 * jax.random.normal(ks[10], (hidden, C_out), dtype)   # 1x1 project
    s3, b3 = bn(ks[11], ks[12], ks[13], ks[14], C_out)
    return (w1, s1, b1, dwk, s2, b2, w3, s3, b3)


def ref_forward(x, params, *, stride, expansion_factor):
    """Pure-JAX reference (same math as the PyTorch module in eval mode)."""
    w1, s1, b1, dwk, s2, b2, w3, s3, b3 = params
    N, C_in, L = x.shape
    hidden, C_out = w3.shape
    h = x.astype(jnp.float32)
    if expansion_factor != 1:
        h = jnp.einsum('ncl,ch->nhl', h, w1)
        h = jnp.clip(h * s1.T[None] + b1.T[None], 0.0, 6.0)
    rhs = jnp.transpose(dwk, (1, 0))[:, None, :]                   # (hidden, 1, 3)
    d = lax.conv_general_dilated(
        h, rhs, window_strides=(stride,), padding=[(1, 1)],
        dimension_numbers=('NCH', 'OIH', 'NCH'), feature_group_count=hidden)
    d = jnp.clip(d * s2.T[None] + b2.T[None], 0.0, 6.0)
    y = jnp.einsum('nhl,ho->nol', d, w3)
    y = y * s3.T[None] + b3.T[None]
    if stride == 1 and C_in == C_out:
        y = y + x
    return y


if __name__ == "__main__":
    key = jax.random.PRNGKey(0)

    configs = [
        # (N, C_in, C_out, L, stride, expansion_factor)
        (2, 16, 16, 32, 1, 4),   # expansion + residual connection
        (2, 16, 24, 31, 2, 4),   # stride 2, odd L (padding + decimation)
        (2, 16, 16, 32, 1, 1),   # expansion_factor == 1 (no 1x1 expansion conv)
    ]
    for idx, (N, C_in, C_out, L, stride, ef) in enumerate(configs):
        kx, kp = jax.random.split(jax.random.fold_in(key, idx))
        x = jax.random.normal(kx, (N, C_in, L), jnp.float32)
        params = make_params(kp, C_in, C_out, ef)
        y_ref = ref_forward(x, params, stride=stride, expansion_factor=ef)

        # Exact-semantics check with f32 MXU operands.
        y32 = inverted_residual(x, params, stride=stride, expansion_factor=ef,
                                matmul_dtype=jnp.float32)
        y32 = jax.block_until_ready(y32)
        assert y32.shape == y_ref.shape, (idx, y32.shape, y_ref.shape)
        if not jnp.allclose(y32, y_ref, atol=2e-4, rtol=2e-4):
            err = float(jnp.max(jnp.abs(y32 - y_ref)))
            raise AssertionError(f"f32 kernel mismatch in config {idx}: max abs err {err}")

        # Default fast path: bf16 MXU operands, f32 accumulation.
        ybf = inverted_residual(x, params, stride=stride, expansion_factor=ef)
        ybf = jax.block_until_ready(ybf)
        assert ybf.shape == y_ref.shape, (idx, ybf.shape, y_ref.shape)
        if not jnp.allclose(ybf, y_ref, atol=1e-1, rtol=1e-1):
            err = float(jnp.max(jnp.abs(ybf - y_ref)))
            raise AssertionError(f"bf16 kernel mismatch in config {idx}: max abs err {err}")

    print("KERNEL_OK")
</pallas_src>

<mosaic_0001>
module attributes {stable_mosaic.version = 11 : i64} {
  func.func @kernel(%arg0: i32, %arg1: memref<32x128xf32, #tpu.memory_space<vmem>>, %arg2: memref<128x128xf32, #tpu.memory_space<vmem>>, %arg3: memref<8x128xf32, #tpu.memory_space<vmem>>, %arg4: memref<128x128xf32, #tpu.memory_space<vmem>>, %arg5: memref<1x128xf32, #tpu.memory_space<vmem>>, %arg6: memref<32x128xf32, #tpu.memory_space<vmem>>, %arg7: memref<48x128xf32, #tpu.memory_space<vmem>>) attributes {dimension_semantics = [#tpu.dimension_semantics<parallel>], iteration_bounds = array<i64: 2>, scalar_prefetch = 0 : i64, scratch_operands = 1 : i64, tpu.core_type = #tpu.core_type<tc>, window_params = [{transform_indices = @transform_0, window_bounds = array<i64: 32, 128>}, {pipeline_mode = #tpu.pipeline_mode<synchronous>, transform_indices = @transform_1, window_bounds = array<i64: 128, 128>}, {pipeline_mode = #tpu.pipeline_mode<synchronous>, transform_indices = @transform_2, window_bounds = array<i64: 8, 128>}, {pipeline_mode = #tpu.pipeline_mode<synchronous>, transform_indices = @transform_3, window_bounds = array<i64: 128, 128>}, {pipeline_mode = #tpu.pipeline_mode<synchronous>, transform_indices = @transform_4, window_bounds = array<i64: 1, 128>}, {transform_indices = @transform_5, window_bounds = array<i64: 32, 128>}]} {
    %c0 = arith.constant 0 : index
    %c0_0 = arith.constant 0 : index
    %0 = vector.load %arg1[%c0, %c0_0] : memref<32x128xf32, #tpu.memory_space<vmem>>, vector<32x128xf32>
    %cst = arith.constant 0.000000e+00 : f32
    %1 = vector.broadcast %cst : f32 to vector<8x128xf32>
    %c0_1 = arith.constant 0 : index
    %c0_2 = arith.constant 0 : index
    %2 = vector.load %arg7[%c0_1, %c0_2] : memref<48x128xf32, #tpu.memory_space<vmem>>, vector<8x128xf32>
    tpu.vector_store %arg7[%c0_1, %c0_2], %1 {strides = array<i32>} : memref<48x128xf32, #tpu.memory_space<vmem>>, vector<8x128xf32>,
    %c40 = arith.constant 40 : index
    %c0_3 = arith.constant 0 : index
    %3 = vector.load %arg7[%c40, %c0_3] : memref<48x128xf32, #tpu.memory_space<vmem>>, vector<8x128xf32>
    tpu.vector_store %arg7[%c40, %c0_3], %1 {strides = array<i32>} : memref<48x128xf32, #tpu.memory_space<vmem>>, vector<8x128xf32>,
    %c0_4 = arith.constant 0 : index
    %c0_5 = arith.constant 0 : index
    %4 = vector.load %arg2[%c0_4, %c0_5] : memref<128x128xf32, #tpu.memory_space<vmem>>, vector<128x128xf32>
    %cst_6 = arith.constant dense<0.000000e+00> : vector<32x128xf32>
    %5 = tpu.matmul %0, %4, %cst_6 {dimension_numbers = #tpu.dot_dimension_numbers<[1], [0], [0], [1], [0, 0, 1, 1], [], []>} : vector<32x128xf32>, vector<128x128xf32>, vector<32x128xf32> -> vector<32x128xf32>
    %c4 = arith.constant 4 : index
    %c0_7 = arith.constant 0 : index
    %6 = vector.load %arg3[%c4, %c0_7] : memref<8x128xf32, #tpu.memory_space<vmem>>, vector<1x128xf32>
    %7 = vector.broadcast %6 : vector<1x128xf32> to vector<32x128xf32>
    %8 = arith.addf %5, %7 : vector<32x128xf32>
    %cst_8 = arith.constant 0.000000e+00 : f32
    %cst_9 = arith.constant 6.000000e+00 : f32
    %9 = vector.broadcast %cst_8 : f32 to vector<32x128xf32>
    %10 = arith.maximumf %9, %8 : vector<32x128xf32>
    %11 = vector.broadcast %cst_9 : f32 to vector<32x128xf32>
    %12 = arith.minimumf %11, %10 : vector<32x128xf32>
    %c8 = arith.constant 8 : index
    %c0_10 = arith.constant 0 : index
    %13 = vector.load %arg7[%c8, %c0_10] : memref<48x128xf32, #tpu.memory_space<vmem>>, vector<32x128xf32>
    tpu.vector_store %arg7[%c8, %c0_10], %12 {strides = array<i32>} : memref<48x128xf32, #tpu.memory_space<vmem>>, vector<32x128xf32>,
    %c7 = arith.constant 7 : index
    %c0_11 = arith.constant 0 : index
    %14 = vector.load %arg7[%c7, %c0_11] : memref<48x128xf32, #tpu.memory_space<vmem>>, vector<32x128xf32>
    %c8_12 = arith.constant 8 : index
    %c0_13 = arith.constant 0 : index
    %15 = vector.load %arg7[%c8_12, %c0_13] : memref<48x128xf32, #tpu.memory_space<vmem>>, vector<32x128xf32>
    %c9 = arith.constant 9 : index
    %c0_14 = arith.constant 0 : index
    %16 = vector.load %arg7[%c9, %c0_14] : memref<48x128xf32, #tpu.memory_space<vmem>>, vector<32x128xf32>
    %17 = tpu.iota {dimensions = array<i32: 0>} : vector<32x1xi32>
    %c32_i32 = arith.constant 32 : i32
    %c0_i32 = arith.constant 0 : i32
    %18 = arith.cmpi eq, %c32_i32, %c0_i32 : i32
    %c1_i32 = arith.constant 1 : i32
    %19 = arith.select %18, %c1_i32, %c32_i32 : i32
    %20 = vector.broadcast %19 : i32 to vector<32x1xi32>
    %21 = arith.remsi %17, %20 : vector<32x1xi32>
    %c0_i32_15 = arith.constant 0 : i32
    %22 = vector.broadcast %c0_i32_15 : i32 to vector<32x1xi32>
    %23 = arith.cmpi ne, %21, %22 : vector<32x1xi32>
    %c0_i32_16 = arith.constant 0 : i32
    %24 = vector.broadcast %c0_i32_16 : i32 to vector<32x1xi32>
    %25 = arith.cmpi slt, %21, %24 : vector<32x1xi32>
    %c0_i32_17 = arith.constant 0 : i32
    %26 = arith.cmpi slt, %19, %c0_i32_17 : i32
    %27 = vector.broadcast %26 : i1 to vector<32x1xi1>
    %28 = vector.broadcast %27 : vector<32x1xi1> to vector<32x1xi1>
    %29 = arith.xori %25, %28 : vector<32x1xi1>
    %30 = arith.andi %29, %23 : vector<32x1xi1>
    %31 = vector.broadcast %19 : i32 to vector<32x1xi32>
    %32 = arith.addi %21, %31 : vector<32x1xi32>
    %33 = arith.select %30, %32, %21 : vector<32x1xi1>, vector<32x1xi32>
    %c0_i32_18 = arith.constant 0 : i32
    %34 = vector.broadcast %c0_i32_18 : i32 to vector<32x1xi32>
    %35 = arith.cmpi sgt, %33, %34 : vector<32x1xi32>
    %c31_i32 = arith.constant 31 : i32
    %36 = vector.broadcast %c31_i32 : i32 to vector<32x1xi32>
    %37 = arith.cmpi slt, %33, %36 : vector<32x1xi32>
    %c0_19 = arith.constant 0 : index
    %c0_20 = arith.constant 0 : index
    %38 = vector.load %arg3[%c0_19, %c0_20] : memref<8x128xf32, #tpu.memory_space<vmem>>, vector<1x128xf32>
    %c1 = arith.constant 1 : index
    %c0_21 = arith.constant 0 : index
    %39 = vector.load %arg3[%c1, %c0_21] : memref<8x128xf32, #tpu.memory_space<vmem>>, vector<1x128xf32>
    %c2 = arith.constant 2 : index
    %c0_22 = arith.constant 0 : index
    %40 = vector.load %arg3[%c2, %c0_22] : memref<8x128xf32, #tpu.memory_space<vmem>>, vector<1x128xf32>
    %c3 = arith.constant 3 : index
    %c0_23 = arith.constant 0 : index
    %41 = vector.load %arg3[%c3, %c0_23] : memref<8x128xf32, #tpu.memory_space<vmem>>, vector<1x128xf32>
    %cst_24 = arith.constant 0.000000e+00 : f32
    %42 = vector.shape_cast %35 : vector<32x1xi1> to vector<32x1xi1>
    %43 = vector.broadcast %42 : vector<32x1xi1> to vector<32x128xi1>
    %44 = vector.broadcast %cst_24 : f32 to vector<32x128xf32>
    %45 = arith.select %43, %14, %44 : vector<32x128xi1>, vector<32x128xf32>
    %46 = vector.broadcast %38 : vector<1x128xf32> to vector<32x128xf32>
    %47 = arith.mulf %45, %46 : vector<32x128xf32>
    %48 = vector.broadcast %39 : vector<1x128xf32> to vector<32x128xf32>
    %49 = arith.mulf %15, %48 : vector<32x128xf32>
    %50 = arith.addf %47, %49 : vector<32x128xf32>
    %cst_25 = arith.constant 0.000000e+00 : f32
    %51 = vector.shape_cast %37 : vector<32x1xi1> to vector<32x1xi1>
    %52 = vector.broadcast %51 : vector<32x1xi1> to vector<32x128xi1>
    %53 = vector.broadcast %cst_25 : f32 to vector<32x128xf32>
    %54 = arith.select %52, %16, %53 : vector<32x128xi1>, vector<32x128xf32>
    %55 = vector.broadcast %40 : vector<1x128xf32> to vector<32x128xf32>
    %56 = arith.mulf %54, %55 : vector<32x128xf32>
    %57 = arith.addf %50, %56 : vector<32x128xf32>
    %58 = vector.broadcast %41 : vector<1x128xf32> to vector<32x128xf32>
    %59 = arith.addf %57, %58 : vector<32x128xf32>
    %cst_26 = arith.constant 0.000000e+00 : f32
    %cst_27 = arith.constant 6.000000e+00 : f32
    %60 = vector.broadcast %cst_26 : f32 to vector<32x128xf32>
    %61 = arith.maximumf %60, %59 : vector<32x128xf32>
    %62 = vector.broadcast %cst_27 : f32 to vector<32x128xf32>
    %63 = arith.minimumf %62, %61 : vector<32x128xf32>
    %c0_28 = arith.constant 0 : index
    %c0_29 = arith.constant 0 : index
    %64 = vector.load %arg4[%c0_28, %c0_29] : memref<128x128xf32, #tpu.memory_space<vmem>>, vector<128x128xf32>
    %cst_30 = arith.constant dense<0.000000e+00> : vector<32x128xf32>
    %65 = tpu.matmul %63, %64, %cst_30 {dimension_numbers = #tpu.dot_dimension_numbers<[1], [0], [0], [1], [0, 0, 1, 1], [], []>} : vector<32x128xf32>, vector<128x128xf32>, vector<32x128xf32> -> vector<32x128xf32>
    %c0_31 = arith.constant 0 : index
    %c0_32 = arith.constant 0 : index
    %66 = vector.load %arg5[%c0_31, %c0_32] : memref<1x128xf32, #tpu.memory_space<vmem>>, vector<1x128xf32>
    %67 = vector.broadcast %66 : vector<1x128xf32> to vector<32x128xf32>
    %68 = arith.addf %65, %67 : vector<32x128xf32>
    %69 = arith.addf %68, %0 : vector<32x128xf32>
    %c0_33 = arith.constant 0 : index
    %c0_34 = arith.constant 0 : index
    %70 = vector.load %arg6[%c0_33, %c0_34] : memref<32x128xf32, #tpu.memory_space<vmem>>, vector<32x128xf32>
    tpu.vector_store %arg6[%c0_33, %c0_34], %69 {strides = array<i32>} : memref<32x128xf32, #tpu.memory_space<vmem>>, vector<32x128xf32>,
    return
  }
  func.func @transform_0(%arg0: i32) -> (i32, i32) {
    %c0_i32 = arith.constant 0 : i32
    %c0_i32_0 = arith.constant 0 : i32
    return %arg0, %c0_i32 : i32, i32
  }
  func.func @transform_1(%arg0: i32) -> (i32, i32) {
    %c0_i32 = arith.constant 0 : i32
    %c0_i32_0 = arith.constant 0 : i32
    %c0_i32_1 = arith.constant 0 : i32
    return %c0_i32, %c0_i32_0 : i32, i32
  }
  func.func @transform_2(%arg0: i32) -> (i32, i32) {
    %c0_i32 = arith.constant 0 : i32
    %c0_i32_0 = arith.constant 0 : i32
    %c0_i32_1 = arith.constant 0 : i32
    return %c0_i32, %c0_i32_0 : i32, i32
  }
  func.func @transform_3(%arg0: i32) -> (i32, i32) {
    %c0_i32 = arith.constant 0 : i32
    %c0_i32_0 = arith.constant 0 : i32
    %c0_i32_1 = arith.constant 0 : i32
    return %c0_i32, %c0_i32_0 : i32, i32
  }
  func.func @transform_4(%arg0: i32) -> (i32, i32) {
    %c0_i32 = arith.constant 0 : i32
    %c0_i32_0 = arith.constant 0 : i32
    %c0_i32_1 = arith.constant 0 : i32
    return %c0_i32, %c0_i32_0 : i32, i32
  }
  func.func @transform_5(%arg0: i32) -> (i32, i32) {
    %c0_i32 = arith.constant 0 : i32
    %c0_i32_0 = arith.constant 0 : i32
    return %arg0, %c0_i32 : i32, i32
  }
}

</mosaic_0001>

<bundles_post_ra>
// kernel: tpu_custom_call.1
= control target key start
LH: loop header
LB: loop body
LE: loop exit
PB: predicated region body
PF: predicated region fallthrough
CT: control target
= control target key end

     0   :  { %10 = vsyncpa [#allocation4], 0  ;;  %s1615_s0 = inlined_call_operand.hbm [shape: f32[64,128], index: 0, kind: input, shape index: {}]   ;;  %s1616_s1 = inlined_call_operand.hbm [shape: f32[128,128], index: 1, kind: input, shape index: {}]   ;;  %s1617_s2 = inlined_call_operand.hbm [shape: f32[8,128], index: 2, kind: input, shape index: {}]   ;;  %s1618_s3 = inlined_call_operand.hbm [shape: f32[128,128], index: 3, kind: input, shape index: {}]   ;;  %s1619_s4 = inlined_call_operand.vmem [shape: f32[1,128], index: 4, kind: input, shape index: {}]   ;;  %s1620_s5 = inlined_call_operand.hbm [shape: f32[64,128], index: 5, kind: output, shape index: {}]  }
   0x1   :  { %12 = vsyncpa [#allocation4 + $0x1], 0 }
   0x2   :  { %13 = vsyncpa [#allocation7], 0 }
   0x3   :  { %14 = vsyncpa [#allocation10], 0 }
   0x4   :  { %15 = vsyncpa [#allocation5], 0 }
   0x5   :  { %17 = vsyncpa [#allocation5 + $0x1], 0  ;;  %s1312_s18 = smov 0   ;;  %s1314_s19 = smov 0  }
   0x6   :  { %s1316_s20 = smov 0   ;;  %s1318_s21 = smov 0  }
   0x7 LB: > { %s1333_s22 = sadd.s32 4294967295, %s1270_s21   ;;  %s792_s23 = sadd.s32 4294967294, %s1270_s21   ;;  %s1270_s21 = sphi %s1318_s21, %s1645_s21   ;;  %s1266_s20 = sphi %s1316_s20, %s1644_s20   ;;  %s1262_s19 = sphi %s1314_s19, %s1643_s19   ;;  %s1258_s18 = sphi %s1312_s18, %s1642_s18  }
   0x8   : > { %p43_p0 = scmp.ne.s32.totalorder %s1262_s19, %s1258_s18  ;;  %p1621_p1 = scmp.eq.s32.totalorder %s1333_s22, 0 }
   0x9   : > { %p157_p3 = scmp.eq.s32.totalorder %s792_s23, 1  ;;  %p793_p5 = scmp.ge.s32.totalorder %s1270_s21, 1 }
   0xa   : > { %p1342_p4 = por %p1621_p1, %p43_p0  ;;  %p164_p7 = scmp.lt.s32.totalorder %s1270_s21, 3 }
   0xb   : > { %p1347_p6 = por %p157_p3, %p43_p0  ;;  %s1272_s27 = smov [#allocation6]  }
   0xc   : > { %s1624_s24 = scalar_select %p1342_p4, 1, 0 }
   0xd   : > { %s1625_s25 = scalar_select %p1347_p6, 1, 0 }
   0xe   : > { %p1352_p8 = pnand %p793_p5, %p164_p7  ;;  %s176_s28 = sshll.u32 %s1272_s27, 4  ;;  %s1356_s28 = int_to_ptr.vmem [resolvable:$true] %s176_s28 }
   0xf   : > { %s1273_s30 = smov [#allocation8]   ;;  %s1274_s7 = smov [#allocation9]  }
  0x10   : > { %s1626_s26 = scalar_select %p1352_p8, 1, 0 }
  0x11   : > { %p1016_p9 = pneg %p1352_p8  ;;  %s190_s6 = sshll.u32 %s1273_s30, 4  ;;  %s1367_s6 = int_to_ptr.vmem [resolvable:$true] %s190_s6 }
  0x12   : > { %s1369_s8 = sshll.u32 %s1274_s7, 4  ;;  %s1082_s11 = scalar_lea.hbm %s1616_s1, 2048  ;;  %s201_s8 = int_to_ptr.vmem [resolvable:$true] %s1369_s8 }
  0x13   : > { %p1363_p11 = pnand %p1016_p9, %p1621_p1  ;;  %p1083_p12 = scmp.ne.s32.totalorder %s1616_s1, %s1082_s11 }
  0x14   : > { %p1089_p5 = scmp.lt.u32.totalorder %s1082_s11, %s1616_s1 }
  0x15   : > { %p1379_p13 = pneg %p1363_p11 }
  0x17   : > { %p1085_p0 = pnand %p1379_p13, %p1083_p12 }
  0x19   : > { %p1086_p3 = pneg %p1085_p0 }
  0x1b   : > { %p1091_p7 = pnand %p1089_p5, %p1086_p3 }
  0x1d   : > { %1094 = shalt.err (!%p1091_p7)
}
  0x1e   : > { %s1095_s17 = scalar_lea.vmem %s1356_s28, 2048  ;;  %p1103_p2 = scmp.lt.s32.totalorder %s1356_s28, %s1356_s28 }
  0x1f   : > { %p1096_p9 = scmp.ne.s32.totalorder %s1356_s28, %s1095_s17  ;;  %p1104_p6 = scmp.lt.s32.totalorder %s1095_s17, %s1095_s17 }
  0x21   : > { %p1098_p10 = pnand %p1096_p9, %p1379_p13  ;;  %p1105_p12 = por %p1104_p6, %p1103_p2 }
  0x23   : > { %p1099_p1 = pneg %p1098_p10 }
  0x25   : > { %p1106_p0 = pnand %p1105_p12, %p1099_p1 }
  0x27   : > { %1109 = shalt.err (!%p1106_p0)
}
  0x28   : > { %s1275_s23 = smov 128   ;;  %s1276_s27 = smov 8  }
  0x29   : > { %1019 = dma.hbm_to_vmem [thread:$0]  (!%p1363_p11), %s1616_s1, 2048, %s1356_s28, [#allocation7], %s1275_s23, %s1275_s23, %s1276_s27  }
  0x2a   : > { %s1110_s11 = scalar_lea.hbm %s1617_s2, 128 }
  0x2b   : > { %p1111_p1 = scmp.ne.s32.totalorder %s1617_s2, %s1110_s11  ;;  %p1117_p10 = scmp.lt.u32.totalorder %s1110_s11, %s1617_s2 }
  0x2d   : > { %p1113_p2 = pnand %p1111_p1, %p1379_p13 }
  0x2f   : > { %p1114_p6 = pneg %p1113_p2 }
  0x31   : > { %p1119_p3 = pnand %p1117_p10, %p1114_p6 }
  0x33   : > { %1122 = shalt.err (!%p1119_p3)
}
  0x34   : > { %s1123_s28 = scalar_lea.vmem %s1367_s6, 128  ;;  %p1131_p12 = scmp.lt.s32.totalorder %s1367_s6, %s1367_s6 }
  0x35   : > { %p1124_p5 = scmp.ne.s32.totalorder %s1367_s6, %s1123_s28  ;;  %p1132_p0 = scmp.lt.s32.totalorder %s1123_s28, %s1123_s28 }
  0x37   : > { %p1126_p7 = pnand %p1124_p5, %p1379_p13  ;;  %p1133_p1 = por %p1132_p0, %p1131_p12 }
  0x39   : > { %p1127_p9 = pneg %p1126_p7 }
  0x3b   : > { %p1134_p2 = pnand %p1133_p1, %p1127_p9 }
  0x3d   : > { %1137 = shalt.err (!%p1134_p2)
}
  0x3e   : > { %1022 = dma.hbm_to_vmem [thread:$0]  (!%p1363_p11), %s1617_s2, 128, %s1367_s6, [#allocation7]  }
  0x3f   : > { %s1138_s10 = scalar_lea.hbm %s1618_s3, 2048 }
  0x40   : > { %p1139_p6 = scmp.ne.s32.totalorder %s1618_s3, %s1138_s10  ;;  %p1145_p5 = scmp.lt.u32.totalorder %s1138_s10, %s1618_s3 }
  0x42   : > { %p1141_p10 = pnand %p1139_p6, %p1379_p13 }
  0x44   : > { %p1142_p3 = pneg %p1141_p10 }
  0x46   : > { %p1147_p7 = pnand %p1145_p5, %p1142_p3 }
  0x48   : > { %1150 = shalt.err (!%p1147_p7)
}
  0x49   : > { %s1151_s16 = scalar_lea.vmem %s201_s8, 2048  ;;  %p1159_p1 = scmp.lt.s32.totalorder %s201_s8, %s201_s8 }
  0x4a   : > { %p1152_p9 = scmp.ne.s32.totalorder %s201_s8, %s1151_s16  ;;  %p1160_p2 = scmp.lt.s32.totalorder %s1151_s16, %s1151_s16 }
  0x4c   : > { %p1154_p12 = pnand %p1152_p9, %p1379_p13  ;;  %p1161_p4 = por %p1160_p2, %p1159_p1 }
  0x4e   : > { %p1155_p0 = pneg %p1154_p12 }
  0x50   : > { %p1162_p8 = pnand %p1161_p4, %p1155_p0 }
  0x52   : > { %1165 = shalt.err (!%p1162_p8)
}
  0x53   : > { %1025 = dma.hbm_to_vmem [thread:$0]  (!%p1363_p11), %s1618_s3, 2048, %s201_s8, [#allocation10], %s1275_s23, %s1275_s23, %s1276_s27  }
  0x54   : > { %s1449_s14 = sadd.s32 1, %s1270_s21   ;;  %s30_s17 = sadd.s32 1, %s1266_s20 }
  0x55   : > { %s27_s29 = ssub.s32 %s1270_s21, %s1449_s14  ;;  %p37_p8 = scmp.ne.s32.totalorder %s1266_s20, %s1262_s19 }
  0x56   : > { %p28_p4 = scmp.eq.s32.totalorder %s27_s29, 0  ;;  %p38_p13 = scmp.eq.s32.totalorder %s1270_s21, 0 }
  0x57   : > { %p1037_p6 = scmp.lt.s32.totalorder %s1270_s21, 2  ;;  %p1629_p3 = scmp.eq.s32.totalorder %s1333_s22, 1 }
  0x58   : > { %s1459_s30 = scalar_select %p28_p4, %s1266_s20, %s30_s17  }
  0x59   : > { %p39_p10 = por %p38_p13, %p37_p8  ;;  %p1463_p5 = por %p1629_p3, %p37_p8 }
  0x5a   : > { %s217_s9 = sand.u32 1, %s1266_s20   ;;  %s818_s10 = sshll.u32 %s1270_s21, 9 }
  0x5b   : > { %s798_s8 = sshll.u32 %s217_s9, 5  ;;  %s1472_s13 = scalar_lea.hbm %s1615_s0, %s818_s10 }
  0x5c   : > { %s221_s15 = scalar_lea.vmem [#allocation3], %s798_s8  ;;  %p1474_p11 = pnand %p1037_p6, %p39_p10 }
  0x5d   : > { %s228_s16 = sshll.u32 %s221_s15, 4  ;;  %s1480_s28 = scalar_lea.sflag [#allocation4], %s217_s9  ;;  %s1478_s16 = int_to_ptr.vmem [resolvable:$true] %s228_s16 }
  0x5e   : > { %s1166_s29 = scalar_lea.hbm %s1472_s13, 512  ;;  %p1168_p9 = pneg %p1474_p11 }
  0x5f   : > { %p1167_p7 = scmp.ne.s32.totalorder %s1472_s13, %s1166_s29  ;;  %s1171_s8 = scalar_lea.hbm %s1615_s0, 1024 }
  0x60   : > { %p1172_p1 = scmp.lt.u32.totalorder %s1472_s13, %s1615_s0  ;;  %p1173_p2 = scmp.lt.u32.totalorder %s1171_s8, %s1166_s29 }
  0x61   : > { %p1169_p12 = pnand %p1168_p9, %p1167_p7  ;;  %p1175_p8 = scmp.lt.u32.totalorder %s1166_s29, %s1472_s13 }
  0x62   : > { %p1174_p4 = por %p1173_p2, %p1172_p1 }
  0x63   : > { %p1170_p0 = pneg %p1169_p12 }
  0x64   : > { %p1176_p13 = por %p1175_p8, %p1174_p4 }
  0x66   : > { %p1177_p6 = pnand %p1176_p13, %p1170_p0 }
  0x68   : > { %1180 = shalt.err (!%p1177_p6)
}
  0x69   : > { %s1181_s9 = scalar_lea.vmem %s1478_s16, 512  ;;  %s1277_s15 = smov [#allocation3]  }
  0x6a   : > { %p1182_p10 = scmp.ne.s32.totalorder %s1478_s16, %s1181_s9  ;;  %s1186_s17 = sshll.u32 %s1277_s15, 4  ;;  %s1187_s17 = int_to_ptr.vmem [resolvable:$false] %s1186_s17 }
  0x6b   : > { %s1188_s10 = scalar_lea.vmem %s1187_s17, 1024  ;;  %p1189_p12 = scmp.lt.s32.totalorder %s1478_s16, %s1187_s17 }
  0x6c   : > { %p1184_p3 = pnand %p1182_p10, %p1168_p9  ;;  %p1190_p1 = scmp.lt.s32.totalorder %s1188_s10, %s1181_s9 }
  0x6e   : > { %p1185_p7 = pneg %p1184_p3  ;;  %p1191_p2 = por %p1190_p1, %p1189_p12 }
  0x70   : > { %p1192_p4 = pnand %p1191_p2, %p1185_p7 }
  0x72   : > { %1195 = shalt.err (!%p1192_p4)
}
  0x73   : > { %1029 = dma.hbm_to_vmem [thread:$0]  (!%p1474_p11), %s1472_s13, 512, %s1478_s16, %s1480_s28, %s1275_s23, %s1275_s23, %s1276_s27  }
  0x74   : > { %p1632_p9 = scmp.ne.s32.totalorder %s1626_s26, 0 }
  0x75   : > { %s1514_s29 = sand.u32 (!%p1632_p9), 1, %s1262_s19   ;;  %p1633_p0 = scmp.ne.s32.totalorder (!%p1632_p9), %s1624_s24, 0 }
  0x76   : > { %240 = sbr.rel (%p1632_p9) target bundleno = 645 (0x285), region = 40  ;;  %s802_s8 = sshll.u32 (!%p1632_p9), %s1514_s29, 5 }
  0x77   : > { %s243_s11 = scalar_lea.sflag (!%p1632_p9), [#allocation4], %s1514_s29  ;;  %s1520_s6 = scalar_lea.vmem (!%p1632_p9), [#allocation3], %s802_s8 }
  0x7d   : > { %1241 = dma.done.wait (%p1633_p0), %s243_s11, 512  }
  0x7e   : > { %1243 = vsyncadd (%p1633_p0), %s243_s11, 4294966784  ;;  %p1634_p11 = scmp.eq.s32.totalorder %s1333_s22, 0 }
  0x80   : > { %1245 = dma.done.wait (%p1634_p11), [#allocation7], 2176   ;;  %p1635_p8 = pmov %p1634_p11 }
  0x82   : > { %1247 = vsyncadd (%p1635_p8), [#allocation7], 4294965120  ;;  %p1636_p13 = pmov %p1635_p8 }
  0x83   : > { %p1637_p6 = pmov %p1635_p8 }
  0x84   : > { %1249 = dma.done.wait (%p1636_p13), [#allocation10], 2048  }
  0x85   : > { %1251 = vsyncadd (%p1637_p6), [#allocation10], 4294965248  ;;  %v293_v0 = vld [vmem:[#allocation6] sm:$0xff]  ;;  %v294_v1 = vld [vmem:[#allocation6 + $0x8] sm:$0xff]  ;;  %v1278_v40 = vmov 0.0   ;;  %v423_v57 = vlaneseq  ;;  %s284_s23 = scalar_lea.vmem [#allocation11], %s802_s8 }
  0x86   : > { %v295_v2 = vld [vmem:[#allocation6 + $0x10] sm:$0xff]  ;;  %v936_v3 = vpack.c.bf16 %v294_v1, %v293_v0  ;;  %v296_v4 = vld [vmem:[#allocation6 + $0x18] sm:$0xff]  ;;  %v297_v6 = vld [vmem:[#allocation6 + $0x20] sm:$0xff]  ;;  %291 = vst [vmem:[#allocation2] sm:$0xff] %v1278_v40  ;;  %s690_s27 = sshll.u32 %s284_s23, 4  ;;  %s819_s13 = sshll.u32 %s1333_s22, 9  ;;  %s1564_s27 = int_to_ptr.vmem [resolvable:$true] %s690_s27 }
  0x87   : > { %v940_v5 = vpack.c.bf16 %v296_v4, %v295_v2  ;;  %v298_v7 = vld [vmem:[#allocation6 + $0x28] sm:$0xff]  ;;  %v1535_v9 = vld [vmem:[%s1520_s6] sm:$0xff]  ;;  %v299_v10 = vld [vmem:[#allocation6 + $0x30] sm:$0xff]  ;;  %292 = vst [vmem:[#allocation2 + $0x28] sm:$0xff] %v1278_v40  ;;  %v424_v1 = vshrl.u32 %v423_v57, 7  ;;  %s1570_s12 = scalar_lea.hbm %s1620_s5, %s819_s13  ;;  %s677_s22 = scalar_lea.sflag [#allocation5], %s1514_s29 }
  0x88   : > { %937 = vmatprep.subr.bf16.mxu0 %v936_v3  ;;  %v944_v8 = vpack.c.bf16 %v298_v7, %v297_v6  ;;  %v300_v11 = vld [vmem:[#allocation6 + $0x38] sm:$0xff]  ;;  %892 = vmatprep.mubr.f32.mxu0 %v1535_v9  ;;  %v560_v12 = vld [vmem:[#allocation9] sm:$0xff]  ;;  %v561_v13 = vld [vmem:[#allocation9 + $0x8] sm:$0xff]  ;;  %s1196_s9 = scalar_lea.vmem %s1564_s27, 512  ;;  %s1279_s15 = smov [#allocation11]  }
  0x89   : > { %939 = vmatpush3.bf16.msra.mxu0 %v936_v3  ;;  %v968_v14 = vpack.c.bf16 %v561_v13, %v560_v12  ;;  %v948_v15 = vpack.c.bf16 %v300_v11, %v299_v10  ;;  %v301_v16 = vld [vmem:[#allocation6 + $0x40] sm:$0xff]  ;;  %v302_v17 = vld [vmem:[#allocation6 + $0x48] sm:$0xff]  ;;  %v303_v19 = vld [vmem:[#allocation6 + $0x50] sm:$0xff]  ;;  %v432_v7 = vand.u32 31, %v424_v1  ;;  %p1197_p10 = scmp.ne.s32.totalorder %s1564_s27, %s1196_s9  ;;  %s1200_s17 = sshll.u32 %s1279_s15, 4  ;;  %s1201_s17 = int_to_ptr.vmem [resolvable:$false] %s1200_s17 }
  0x8a   : > { %941 = vmatprep.subr.bf16.mxu0 %v940_v5  ;;  %v952_v18 = vpack.c.bf16 %v302_v17, %v301_v16  ;;  %v304_v20 = vld [vmem:[#allocation6 + $0x58] sm:$0xff]  ;;  %v305_v22 = vld [vmem:[#allocation6 + $0x60] sm:$0xff]  ;;  %v306_v23 = vld [vmem:[#allocation6 + $0x68] sm:$0xff]  ;;  %s1202_s10 = scalar_lea.vmem %s1201_s17, 1024  ;;  %p1203_p12 = scmp.lt.s32.totalorder %s1564_s27, %s1201_s17 }
  0x8b   : > { %969 = vmatprep.subr.bf16.mxu1 %v968_v14  ;;  %v956_v21 = vpack.c.bf16 %v304_v20, %v303_v19  ;;  %v960_v24 = vpack.c.bf16 %v306_v23, %v305_v22  ;;  %v307_v25 = vld [vmem:[#allocation6 + $0x70] sm:$0xff]  ;;  %v308_v26 = vld [vmem:[#allocation6 + $0x78] sm:$0xff]  ;;  %v1539_v28 = vld [vmem:[%s1520_s6 + $0x8] sm:$0xff]  ;;  %vm476_vm0 = vcmp.gt.s32.totalorder %v432_v7, 0  ;;  %p1198_p3 = pnand %p1197_p10, %p1463_p5  ;;  %p1204_p1 = scmp.lt.s32.totalorder %s1202_s10, %s1196_s9 }
  0x8c   : > { %971 = vmatpush3.bf16.msra.mxu1 %v968_v14  ;;  %v964_v27 = vpack.c.bf16 %v308_v26, %v307_v25  ;;  %v1542_v29 = vld [vmem:[%s1520_s6 + $0x10] sm:$0xff]  ;;  %v1547_v30 = vld [vmem:[%s1520_s6 + $0x18] sm:$0xff]  ;;  %v563_v32 = vld [vmem:[#allocation9 + $0x18] sm:$0xff] }
  0x8d   : > { %943 = vmatpush3.bf16.msra.mxu0 %v940_v5  ;;  %v562_v31 = vld [vmem:[#allocation9 + $0x10] sm:$0xff]  ;;  %v564_v34 = vld [vmem:[#allocation9 + $0x20] sm:$0xff]  ;;  %v565_v35 = vld [vmem:[#allocation9 + $0x28] sm:$0xff]  ;;  %p1199_p7 = pneg %p1198_p3  ;;  %p1205_p2 = por %p1204_p1, %p1203_p12 }
  0x8e   : > { %945 = vmatprep.subr.bf16.mxu0 %v944_v8  ;;  %v972_v33 = vpack.c.bf16 %v563_v32, %v562_v31  ;;  %v976_v36 = vpack.c.bf16 %v565_v35, %v564_v34  ;;  %v566_v37 = vld [vmem:[#allocation9 + $0x30] sm:$0xff]  ;;  %v567_v38 = vld [vmem:[#allocation9 + $0x38] sm:$0xff]  ;;  %v568_v41 = vld [vmem:[#allocation9 + $0x40] sm:$0xff] }
  0x8f   : > { %v980_v39 = vpack.c.bf16 %v567_v38, %v566_v37  ;;  %v569_v42 = vld [vmem:[#allocation9 + $0x48] sm:$0xff]  ;;  %v570_v44 = vld [vmem:[#allocation9 + $0x50] sm:$0xff]  ;;  %v571_v45 = vld [vmem:[#allocation9 + $0x58] sm:$0xff]  ;;  %p1206_p4 = pnand %p1205_p2, %p1199_p7 }
  0x90   : > { %973 = vmatprep.subr.bf16.mxu1 %v972_v33  ;;  %v984_v43 = vpack.c.bf16 %v569_v42, %v568_v41  ;;  %v988_v46 = vpack.c.bf16 %v571_v45, %v570_v44  ;;  %v572_v47 = vld [vmem:[#allocation9 + $0x60] sm:$0xff]  ;;  %v573_v48 = vld [vmem:[#allocation9 + $0x68] sm:$0xff]  ;;  %v574_v50 = vld [vmem:[#allocation9 + $0x70] sm:$0xff] }
  0x91   : > { %947 = vmatpush3.bf16.msra.mxu0 %v944_v8  ;;  %975 = vmatpush3.bf16.msra.mxu1 %v972_v33  ;;  %v992_v49 = vpack.c.bf16 %v573_v48, %v572_v47  ;;  %v575_v51 = vld [vmem:[#allocation9 + $0x78] sm:$0xff]  ;;  %v427_v8 = vadd.s32 24, %v424_v1 }
  0x92   : > { %949 = vmatprep.subr.bf16.mxu0 %v948_v15  ;;  %977 = vmatprep.subr.bf16.mxu1 %v976_v36  ;;  %v996_v52 = vpack.c.bf16 %v575_v51, %v574_v50  ;;  %v807_v53 = vld [vmem:[#allocation8 + $0x4] ss:$0 sm:$0xff]  ;;  %v808_v11 = vld [vmem:[#allocation8] ss:$0 sm:$0xff]  ;;  %v809_v13 = vld [vmem:[#allocation8 + $0x1] ss:$0 sm:$0xff] }
  0x93   : > { %v453_v12 = vand.u32 31, %v427_v8  ;;  %v810_v17 = vld [vmem:[#allocation8 + $0x2] ss:$0 sm:$0xff]  ;;  %v811_v34 = vld [vmem:[#allocation8 + $0x3] ss:$0 sm:$0xff] }
  0x95   : > { %951 = vmatpush3.bf16.msra.mxu0 %v948_v15  ;;  %979 = vmatpush3.bf16.msra.mxu1 %v976_v36  ;;  %vm1550_vm1 = vcmp.lt.s32.totalorder %v453_v12, 31 }
  0x96   : > { %953 = vmatprep.subr.bf16.mxu0 %v952_v18  ;;  %981 = vmatprep.subr.bf16.mxu1 %v980_v39 }
  0x99   : > { %955 = vmatpush3.bf16.msra.mxu0 %v952_v18  ;;  %983 = vmatpush3.bf16.msra.mxu1 %v980_v39 }
  0x9a   : > { %957 = vmatprep.subr.bf16.mxu0 %v956_v21  ;;  %985 = vmatprep.subr.bf16.mxu1 %v984_v43 }
  0x9d   : > { %959 = vmatpush3.bf16.msra.mxu0 %v956_v21  ;;  %987 = vmatpush3.bf16.msra.mxu1 %v984_v43 }
  0x9e   : > { %961 = vmatprep.subr.bf16.mxu0 %v960_v24  ;;  %989 = vmatprep.subr.bf16.mxu1 %v988_v46 }
  0xa1   : > { %963 = vmatpush3.bf16.msra.mxu0 %v960_v24  ;;  %991 = vmatpush3.bf16.msra.mxu1 %v988_v46 }
  0xa2   : > { %965 = vmatprep.subr.bf16.mxu0 %v964_v27  ;;  %993 = vmatprep.subr.bf16.mxu1 %v992_v49 }
  0xa5   : > { %967 = vmatpush3.bf16.msra.mxu0 %v964_v27  ;;  %995 = vmatpush3.bf16.msra.mxu1 %v992_v49 }
  0xa6   : > { %997 = vmatprep.subr.bf16.mxu1 %v996_v52 }
  0xa8   : > { %893 = vmatmul.mubr.f32.vlgmr.msra.gmra.mrb[0].mxu0 %v1539_v28 }
  0xa9   : > { %895 = vmatprep.mubr.f32.mxu0 %v1542_v29  ;;  %999 = vmatpush3.bf16.msra.mxu1 %v996_v52 }
  0xac   : > { %896 = vmatmul.mubr.f32.gmra.mrb[2].mxu0 %v1547_v30 }
 0x17b   : > { %v894_v54 = vpop.f32.mrb[0].mxu0 }
 0x17c   : > { %v386_v55 = vadd.f32 %v894_v54, %v807_v53  ;;  %v380_v56 = vpop.f32.mrb[1].mxu0 }
 0x17d   : > { %v381_v58 = vadd.f32 %v807_v53, %v380_v56 }
 0x17e   : > { %v400_v59 = vmax.f32 %v386_v55, 0.0 }
 0x17f   : > { %v399_v60 = vmax.f32 %v381_v58, 0.0  ;;  %v897_v61 = vpop.f32.mrb[2].mxu0 }
 0x180   : > { %v404_v62 = vmin.f32 %v400_v59, 6.0  ;;  %v396_v63 = vadd.f32 %v897_v61, %v807_v53  ;;  %v390_v0 = vpop.f32.mrb[3].mxu0 }
 0x181   : > { %v403_v2 = vmin.f32 %v399_v60, 6.0  ;;  %v391_v3 = vadd.f32 %v807_v53, %v390_v0 }
 0x182   : > { %408 = vst [vmem:[#allocation2 + $0x10] sm:$0xff] %v404_v62  ;;  %v402_v4 = vmax.f32 %v396_v63, 0.0  ;;  %v513_v23 = vmul.f32 %v809_v13, %v404_v62  ;;  %v812_v62 = vld [vmem:[%s1619_s4] ss:$0 sm:$0xff] }
 0x183   : > { %407 = vst [vmem:[#allocation2 + $0x8] sm:$0xff] %v403_v2  ;;  %v401_v5 = vmax.f32 %v391_v3, 0.0  ;;  %v512_v21 = vmul.f32 %v809_v13, %v403_v2 }
 0x184   : > { %v406_v6 = vmin.f32 %v402_v4, 6.0 }
 0x185   : > { %v405_v10 = vmin.f32 %v401_v5, 6.0 }
 0x186   : > { %410 = vst [vmem:[#allocation2 + $0x20] sm:$0xff] %v406_v6  ;;  %v515_v42 = vmul.f32 %v809_v13, %v406_v6 }
 0x187   : > { %409 = vst [vmem:[#allocation2 + $0x18] sm:$0xff] %v405_v10  ;;  %v514_v33 = vmul.f32 %v809_v13, %v405_v10 }
 0x18a   : > { %v411_v14 = vld [vmem:[#allocation2 + $0x7] sm:$0xff]  ;;  %v412_v15 = vld [vmem:[#allocation2 + $0xf] sm:$0xff] }
 0x18b   : > { %v419_v16 = vld [vmem:[#allocation2 + $0x9] sm:$0xff]  ;;  %v496_v18 = vsel %vm476_vm0, %v411_v14, 0.0  ;;  %v505_v19 = vmul.f32 %v808_v11, %v412_v15 }
 0x18c   : > { %v504_v20 = vmul.f32 %v808_v11, %v496_v18  ;;  %v536_v26 = vmul.f32 %v810_v17, %v419_v16 }
 0x18d   : > { %v422_v24 = vld [vmem:[#allocation2 + $0x21] sm:$0xff]  ;;  %v517_v35 = vadd.f32 %v513_v23, %v505_v19 }
 0x18e   : > { %v516_v25 = vadd.f32 %v512_v21, %v504_v20  ;;  %v420_v27 = vld [vmem:[#allocation2 + $0x11] sm:$0xff]  ;;  %v421_v32 = vld [vmem:[#allocation2 + $0x19] sm:$0xff]  ;;  %v531_v39 = vsel %vm1550_vm1, %v422_v24, 0.0 }
 0x18f   : > { %v413_v31 = vld [vmem:[#allocation2 + $0x17] sm:$0xff]  ;;  %v537_v36 = vmul.f32 %v810_v17, %v420_v27  ;;  %v414_v38 = vld [vmem:[#allocation2 + $0x1f] sm:$0xff]  ;;  %v538_v45 = vmul.f32 %v810_v17, %v421_v32  ;;  %v539_v48 = vmul.f32 %v810_v17, %v531_v39 }
 0x190   : > { %v506_v37 = vmul.f32 %v808_v11, %v413_v31  ;;  %v540_v40 = vadd.f32 %v536_v26, %v516_v25  ;;  %v507_v41 = vmul.f32 %v808_v11, %v414_v38 }
 0x191   : > { %v541_v43 = vadd.f32 %v537_v36, %v517_v35 }
 0x192   : > { %v518_v44 = vadd.f32 %v514_v33, %v506_v37  ;;  %v548_v46 = vadd.f32 %v811_v34, %v540_v40  ;;  %v519_v47 = vadd.f32 %v515_v42, %v507_v41 }
 0x193   : > { %v549_v49 = vadd.f32 %v811_v34, %v541_v43 }
 0x194   : > { %v542_v50 = vadd.f32 %v538_v45, %v518_v44  ;;  %v552_v51 = vmax.f32 %v548_v46, 0.0  ;;  %v543_v52 = vadd.f32 %v539_v48, %v519_v47 }
 0x195   : > { %v553_v53 = vmax.f32 %v549_v49, 0.0 }
 0x196   : > { %v550_v54 = vadd.f32 %v811_v34, %v542_v50  ;;  %v556_v55 = vmin.f32 %v552_v51, 6.0  ;;  %v551_v56 = vadd.f32 %v811_v34, %v543_v52 }
 0x197   : > { %v557_v57 = vmin.f32 %v553_v53, 6.0 }
 0x198   : > { %v554_v58 = vmax.f32 %v550_v54, 0.0  ;;  %930 = vmatprep.mubr.f32.mxu1 %v556_v55  ;;  %v555_v59 = vmax.f32 %v551_v56, 0.0 }
 0x199   : > { %931 = vmatmul.mubr.f32.vlgmr.msra.gmra.mrb[0].mxu1 %v557_v57 }
 0x19a   : > { %v558_v60 = vmin.f32 %v554_v58, 6.0  ;;  %v559_v61 = vmin.f32 %v555_v59, 6.0 }
 0x19c   : > { %933 = vmatprep.mubr.f32.mxu1 %v558_v60 }
 0x19d   : > { %934 = vmatmul.mubr.f32.gmra.mrb[2].mxu1 %v559_v61 }
 0x26c   : > { %v932_v63 = vpop.f32.mrb[0].mxu1 }
 0x26d   : > { %v655_v0 = vadd.f32 %v932_v63, %v812_v62  ;;  %v649_v1 = vpop.f32.mrb[1].mxu1 }
 0x26e   : > { %v650_v2 = vadd.f32 %v812_v62, %v649_v1 }
 0x26f   : > { %v669_v3 = vadd.f32 %v655_v0, %v1539_v28 }
 0x270   : > { %v668_v4 = vadd.f32 %v650_v2, %v1535_v9  ;;  %v935_v5 = vpop.f32.mrb[2].mxu1 }
 0x271   : > { %673 = vst [vmem:[%s284_s23 + $0x8] sm:$0xff] %v669_v3  ;;  %v665_v6 = vadd.f32 %v935_v5, %v812_v62  ;;  %v659_v7 = vpop.f32.mrb[3].mxu1 }
 0x272   : > { %672 = vst [vmem:[%s284_s23] sm:$0xff] %v668_v4  ;;  %v660_v8 = vadd.f32 %v812_v62, %v659_v7 }
 0x273   : > { %v671_v28 = vadd.f32 %v665_v6, %v1547_v30 }
 0x274   : > { %v670_v9 = vadd.f32 %v660_v8, %v1542_v29 }
 0x275   : > { %675 = vst [vmem:[%s284_s23 + $0x18] sm:$0xff] %v671_v28 }
 0x276   : > { %674 = vst [vmem:[%s284_s23 + $0x10] sm:$0xff] %v670_v9 }
 0x277   : > { %1209 = shalt.err (!%p1206_p4)
}
 0x278   : > { %s1210_s8 = scalar_lea.hbm %s1570_s12, 512  ;;  %s1214_s24 = scalar_lea.hbm %s1620_s5, 1024 }
 0x279   : > { %p1211_p9 = scmp.ne.s32.totalorder %s1570_s12, %s1210_s8  ;;  %p1215_p8 = scmp.lt.u32.totalorder %s1570_s12, %s1620_s5 }
 0x27a   : > { %p1216_p13 = scmp.lt.u32.totalorder %s1214_s24, %s1210_s8  ;;  %p1218_p10 = scmp.lt.u32.totalorder %s1210_s8, %s1570_s12 }
 0x27b   : > { %p1212_p0 = pnand %p1211_p9, %p1463_p5 }
 0x27c   : > { %p1217_p6 = por %p1216_p13, %p1215_p8 }
 0x27d   : > { %p1213_p11 = pneg %p1212_p0 }
 0x27e   : > { %p1219_p3 = por %p1218_p10, %p1217_p6 }
 0x280   : > { %p1220_p7 = pnand %p1219_p3, %p1213_p11 }
 0x282   : > { %1223 = shalt.err (!%p1220_p7)
}
 0x283   : > { %s1280_s13 = smov 128   ;;  %s1281_s16 = smov 8  }
 0x284   : > { %1014 = dma.vmem_to_hbm [thread:$0]  (%p1463_p5), %s1564_s27, 512, %s1570_s12, %s677_s22, %s1280_s13, %s1280_s13, %s1281_s16  }
 0x285 PF: > { %s705_s28 = sand.u32 1, %s1258_s18   ;;  %p1640_p12 = scmp.ne.s32.totalorder %s1625_s25, 0 }
 0x286   : > { %p1641_p1 = scmp.ge.s32.totalorder %s1270_s21, 2  ;;  %s706_s9 = scalar_lea.sflag [#allocation5], %s705_s28 }
 0x288   : > { %p1031_p2 = pnand %p1641_p1, %p1640_p12 }
 0x28a   : > { %1253 = dma.done.wait (!%p1031_p2), %s706_s9, 512  }
 0x28b   : > { %1255 = vsyncadd (!%p1031_p2), %s706_s9, 4294966784  ;;  %p20_p4 = scmp.ge.s32.totalorder %s1449_s14, 4   ;;  %s1642_s18 = smov %s1262_s19 }
 0x28c   : > { %s1643_s19 = smov %s1266_s20  ;;  %s1644_s20 = smov %s1459_s30 }
 0x28d   : > { %s1645_s21 = smov %s1449_s14  ;;  %22 = sbr.rel (!%p20_p4) target bundleno = 7 (0x7), region = 97 }
 0x294   :  { %711 = vsyncpa [#allocation4], 1 }
 0x295   :  { %713 = vsyncpa [#allocation4 + $0x1], 1 }
 0x296   :  { %714 = vsyncpa [#allocation7], 1 }
 0x297   :  { %715 = vsyncpa [#allocation10], 1 }
 0x298   :  { %716 = vsyncpa [#allocation5], 1 }
 0x299   :  { %718 = vsyncpa [#allocation5 + $0x1], 1 }

</bundles_post_ra>
